<compile_context>
chip_gen: v7x
topology: tpu7x:2x2x1
jax: 0.10.0
libtpu: 0.0.40
codegen_flags: <defaults>
</compile_context>

<pallas_src>
import numpy as np
import jax
import jax.numpy as jnp
from jax import lax
from jax.experimental import pallas as pl
from jax.experimental.pallas import tpu as pltpu


def _round_up(x, m):
    return ((x + m - 1) // m) * m


def _make_gru_kernel(B, T, H):
    """B = valid GRU time steps (original batch), T = valid GRU batch rows (T_max)."""

    def kernel(x_ref, wih_ref, whh_ref, bih_ref, bhhn_ref, wfc_ref, bfc_ref,
               out_ref, gi_ref, means_ref):
        B_pad, T_pad, E = x_ref.shape
        GL = gi_ref.shape[-1]                       # packed gate lane width (>= 3H)

        # ---- Phase 1: hoisted input projection (one big MXU matmul) ----------
        # gi = x @ W_ih_packed + (b_ih with b_hr/b_hz folded in).  Rows for padded
        # GRU-batch positions (t >= T) are zeroed so their hidden state stays 0.
        x_all = x_ref[...].reshape(B_pad * T_pad, E)
        gi_all = jnp.dot(x_all, wih_ref[...], preferred_element_type=jnp.float32)
        gi_all = (gi_all + bih_ref[...]).reshape(B_pad, T_pad, GL)
        t_ids = lax.broadcasted_iota(jnp.int32, (1, T_pad, GL), 1)
        row_valid = (t_ids < T).astype(jnp.float32)
        gi_ref[...] = gi_all * row_valid

        means_ref[...] = jnp.zeros_like(means_ref)

        # hoisted once (1 vreg): n-gate hidden bias, zeroed on padded rows
        tT = lax.broadcasted_iota(jnp.int32, (T_pad, GL), 0)
        bhhn_b = (tT < T).astype(jnp.float32) * bhhn_ref[...]        # (T_pad, GL)

        # ---- Phase 2: serial GRU recurrence over the B axis -------------------
        # Gates packed in one 128-lane tile: r @ [0:H), z @ [H:2H), n @ [2H:3H).
        def step(i, h):
            gi = gi_ref[i]                                           # (T_pad, GL)
            # read whh_ref inside the step: stream the operand per matmul, no
            # long-lived vreg block across the unrolled loop.
            gh = jnp.dot(h, whh_ref[...],
                         preferred_element_type=jnp.float32) + bhhn_b
            s = jax.nn.sigmoid(gi + gh)                  # r, z in their home lanes
            r_n = pltpu.roll(s, shift=2 * H, axis=1)     # r moved onto n-gate lanes (XLU)
            n_full = jnp.tanh(gi + r_n * gh)             # n in lanes [2H:3H)
            z = s[:, H:2 * H]                            # (T_pad, H)
            n = n_full[:, 2 * H:3 * H]                   # (T_pad, H)
            h_new = (1.0 - z) * n + z * h                # (T_pad, H)
            # mean folded into the loop: sublane reduce over the T rows (padded
            # rows are exactly 0, so no mask needed here).
            means_ref[pl.ds(i, 1), :] = jnp.sum(h_new, axis=0, keepdims=True)
            return h_new

        h0 = jnp.zeros((T_pad, H), jnp.float32)
        lax.fori_loop(0, B, step, h0, unroll=min(B, 8))

        # ---- Phase 3: epilogue: mean scale, fc, sigmoid, lane-dense store -----
        means = means_ref[...] * (1.0 / T)                           # (B_pad, H)
        logits = jnp.sum(means * wfc_ref[...], axis=-1, keepdims=True) + bfc_ref[0, 0]
        vals = jax.nn.sigmoid(logits)                                # (B_pad, 1)
        out_ref[...] = jnp.broadcast_to(vals, out_ref.shape)         # one lane-dense store

    return kernel


def pack_params(wih_t, whh_t, bih, bhh, wfc, bfc):
    """One-time weight preprocessing (out of the per-call path).

    Inputs are PyTorch-GRU-style, already transposed, gate order [r, z, n]:
      wih_t (E, 3H), whh_t (H, 3H), bih (1, 3H), bhh (1, 3H), wfc (1, H), bfc (1, 1).
    Gates are packed contiguously at lane offsets 0 / H / 2H inside one GL-lane tile.
    """
    E = wih_t.shape[0]
    H = whh_t.shape[0]
    GL = max(128, _round_up(3 * H, 128))   # designed for 3H <= 128 (single lane tile)

    wih_p = jnp.zeros((E, GL), jnp.float32).at[:, :3 * H].set(wih_t.astype(jnp.float32))
    whh_p = jnp.zeros((H, GL), jnp.float32).at[:, :3 * H].set(whh_t.astype(jnp.float32))
    # fold b_hr / b_hz into the hoisted input projection; b_hn must stay inside r*(...)
    bih_p = jnp.zeros((1, GL), jnp.float32)
    bih_p = bih_p.at[:, :2 * H].set(bih[:, :2 * H].astype(jnp.float32)
                                    + bhh[:, :2 * H].astype(jnp.float32))
    bih_p = bih_p.at[:, 2 * H:3 * H].set(bih[:, 2 * H:3 * H].astype(jnp.float32))
    bhhn_p = jnp.zeros((1, GL), jnp.float32).at[:, 2 * H:3 * H].set(
        bhh[:, 2 * H:3 * H].astype(jnp.float32))
    return dict(H=H, GL=GL, wih=wih_p, whh=whh_p, bih=bih_p, bhhn=bhhn_p,
                wfc=wfc.astype(jnp.float32), bfc=bfc.astype(jnp.float32))


def gru_mean_fc_sigmoid(x_unpack, params):
    """x_unpack: (B, T, E) f32; params from pack_params."""
    B, T, E = x_unpack.shape
    H, GL = params["H"], params["GL"]

    B_pad = _round_up(B, 8)
    T_pad = _round_up(T, 8)

    # E is NOT padded to 128: full-dim blocks are legal and cut HBM/VMEM traffic.
    x_p = jnp.zeros((B_pad, T_pad, E), jnp.float32).at[:B, :T, :].set(
        x_unpack.astype(jnp.float32))

    kernel = _make_gru_kernel(B, T, H)

    flops = (2 * B_pad * T_pad * E * GL                 # hoisted input projection
             + B * (2 * T_pad * H * GL                  # recurrent matmul per step
                    + 10 * T_pad * GL))                 # gate elementwise
    transcendentals = 2 * B * T_pad * GL + B_pad
    bytes_accessed = 4 * (x_p.size + params["wih"].size + params["whh"].size
                          + 2 * GL + H + 1 + B_pad * 128)

    out = pl.pallas_call(
        kernel,
        out_shape=jax.ShapeDtypeStruct((B_pad, 128), jnp.float32),
        grid_spec=pltpu.PrefetchScalarGridSpec(
            num_scalar_prefetch=0,
            grid=(1,),
            in_specs=[
                pl.BlockSpec((B_pad, T_pad, E), lambda i: (0, 0, 0)),   # x
                pl.BlockSpec((E, GL), lambda i: (0, 0)),                # W_ih packed
                pl.BlockSpec((H, GL), lambda i: (0, 0)),                # W_hh packed
                pl.BlockSpec((1, GL), lambda i: (0, 0)),                # b_ih (+ b_hr,b_hz)
                pl.BlockSpec((1, GL), lambda i: (0, 0)),                # b_hn only
                pl.BlockSpec((1, H), lambda i: (0, 0)),                 # fc weight
                pl.BlockSpec(memory_space=pltpu.MemorySpace.SMEM),      # fc bias scalar
            ],
            out_specs=pl.BlockSpec((B_pad, 128), lambda i: (0, 0)),
            scratch_shapes=[
                pltpu.VMEM((B_pad, T_pad, GL), jnp.float32),   # hoisted gi
                pltpu.VMEM((B_pad, H), jnp.float32),           # per-step mean accumulator
            ],
        ),
        compiler_params=pltpu.CompilerParams(dimension_semantics=("arbitrary",)),
        cost_estimate=pl.CostEstimate(flops=flops, transcendentals=transcendentals,
                                      bytes_accessed=bytes_accessed),
    )(x_p, params["wih"], params["whh"], params["bih"], params["bhhn"],
      params["wfc"], params["bfc"])
    return out[:B, 0]


def rnn_forward(x_idx, lengths, vectors, params):
    """Glue (embedding gather, pack/pad emulation) in plain JAX; hot path in Pallas."""
    # embedding: x_idx (S, B) -> (S, B, E); transpose(0,1) -> (B, S, E)
    emb = vectors[x_idx]
    emb = jnp.transpose(emb, (1, 0, 2))
    # pack_padded_sequence + pad_packed_sequence (batch_first=True):
    # truncate to max(lengths) and zero positions beyond each sequence length.
    t_max = int(max(lengths))
    emb = emb[:, :t_max, :]
    mask = (jnp.arange(t_max)[None, :] < jnp.asarray(lengths)[:, None]).astype(emb.dtype)
    x_unpack = emb * mask[:, :, None]          # (B, T_max, E)
    return gru_mean_fc_sigmoid(x_unpack, params)


def _reference(x_idx, lengths, vectors, wih_t, whh_t, bih, bhh, wfc, bfc):
    """Pure-JAX reference reproducing the PyTorch forward, for verification."""
    emb = vectors[x_idx]
    emb = jnp.transpose(emb, (1, 0, 2))
    t_max = int(max(lengths))
    emb = emb[:, :t_max, :]
    mask = (jnp.arange(t_max)[None, :] < jnp.asarray(lengths)[:, None]).astype(emb.dtype)
    x_unpack = emb * mask[:, :, None]
    H = whh_t.shape[0]

    def step(h, xt):
        gi = xt @ wih_t + bih
        gh = h @ whh_t + bhh
        r = jax.nn.sigmoid(gi[:, :H] + gh[:, :H])
        z = jax.nn.sigmoid(gi[:, H:2 * H] + gh[:, H:2 * H])
        n = jnp.tanh(gi[:, 2 * H:] + r * gh[:, 2 * H:])
        h_new = (1.0 - z) * n + z * h
        return h_new, h_new

    _, hs = jax.lax.scan(step, jnp.zeros((t_max, H), jnp.float32), x_unpack)
    avg = hs.mean(axis=1)                       # (B, H)
    return jax.nn.sigmoid(avg @ wfc[0] + bfc[0, 0])


if __name__ == "__main__":
    # Small, deterministic config (hidden_dim must equal embedding_dim for the
    # original module's fc(embedding_dim, 1) applied to GRU hidden states).
    V, E, H = 50, 32, 32
    S, B = 8, 4
    lengths = [7, 6, 5, 3]   # sorted descending (pack_padded_sequence default)

    key = jax.random.PRNGKey(0)
    ks = jax.random.split(key, 8)
    scale = 1.0 / np.sqrt(H)

    vectors = jax.random.normal(ks[0], (V, E), dtype=jnp.float32)              # vocab.vectors
    wih_t = jax.random.uniform(ks[1], (E, 3 * H), jnp.float32, -scale, scale)  # W_ih^T  [r,z,n]
    whh_t = jax.random.uniform(ks[2], (H, 3 * H), jnp.float32, -scale, scale)  # W_hh^T
    bih = jax.random.uniform(ks[3], (1, 3 * H), jnp.float32, -scale, scale)
    bhh = jax.random.uniform(ks[4], (1, 3 * H), jnp.float32, -scale, scale)
    wfc = jax.random.uniform(ks[5], (1, H), jnp.float32, -scale, scale)
    bfc = jax.random.uniform(ks[6], (1, 1), jnp.float32, -scale, scale)

    x_idx = jax.random.randint(ks[7], (S, B), 0, V, dtype=jnp.int32)           # (seq, batch)

    # one-time weight packing (out of the per-call path)
    params = jax.tree_util.tree_map(jax.block_until_ready,
                                    pack_params(wih_t, whh_t, bih, bhh, wfc, bfc))

    out = rnn_forward(x_idx, lengths, vectors, params)
    out = jax.block_until_ready(out)

    ref = _reference(x_idx, lengths, vectors, wih_t, whh_t, bih, bhh, wfc, bfc)
    ref = jax.block_until_ready(ref)

    assert out.shape == (B,)
    np.testing.assert_allclose(np.asarray(out), np.asarray(ref), atol=1e-5, rtol=1e-5)
    print("KERNEL_OK")
</pallas_src>

<mosaic_0001>
module attributes {stable_mosaic.version = 11 : i64} {
  func.func @kernel(%arg0: i32, %arg1: memref<8x8x32xf32, #tpu.memory_space<vmem>>, %arg2: memref<32x128xf32, #tpu.memory_space<vmem>>, %arg3: memref<32x128xf32, #tpu.memory_space<vmem>>, %arg4: memref<1x128xf32, #tpu.memory_space<vmem>>, %arg5: memref<1x128xf32, #tpu.memory_space<vmem>>, %arg6: memref<1x32xf32, #tpu.memory_space<vmem>>, %arg7: memref<1x1xf32, #tpu.memory_space<smem>>, %arg8: memref<8x128xf32, #tpu.memory_space<vmem>>, %arg9: memref<8x8x128xf32, #tpu.memory_space<vmem>>, %arg10: memref<8x32xf32, #tpu.memory_space<vmem>>) attributes {dimension_semantics = [#tpu.dimension_semantics<arbitrary>], iteration_bounds = array<i64: 1>, scalar_prefetch = 0 : i64, scratch_operands = 2 : i64, tpu.core_type = #tpu.core_type<tc>, window_params = [{pipeline_mode = #tpu.pipeline_mode<synchronous>, transform_indices = @transform_0, window_bounds = array<i64: 8, 8, 32>}, {pipeline_mode = #tpu.pipeline_mode<synchronous>, transform_indices = @transform_1, window_bounds = array<i64: 32, 128>}, {pipeline_mode = #tpu.pipeline_mode<synchronous>, transform_indices = @transform_2, window_bounds = array<i64: 32, 128>}, {pipeline_mode = #tpu.pipeline_mode<synchronous>, transform_indices = @transform_3, window_bounds = array<i64: 1, 128>}, {pipeline_mode = #tpu.pipeline_mode<synchronous>, transform_indices = @transform_4, window_bounds = array<i64: 1, 128>}, {pipeline_mode = #tpu.pipeline_mode<synchronous>, transform_indices = @transform_5, window_bounds = array<i64: 1, 32>}, {transform_indices = @transform_6, window_bounds = array<i64: 1, 1>}, {pipeline_mode = #tpu.pipeline_mode<synchronous>, transform_indices = @transform_7, window_bounds = array<i64: 8, 128>}]} {
    %c0 = arith.constant 0 : index
    %c0_0 = arith.constant 0 : index
    %c0_1 = arith.constant 0 : index
    %0 = vector.load %arg1[%c0, %c0_0, %c0_1] : memref<8x8x32xf32, #tpu.memory_space<vmem>>, vector<8x8x32xf32>
    %1 = vector.shape_cast %0 : vector<8x8x32xf32> to vector<64x32xf32>
    %c0_2 = arith.constant 0 : index
    %c0_3 = arith.constant 0 : index
    %2 = vector.load %arg2[%c0_2, %c0_3] : memref<32x128xf32, #tpu.memory_space<vmem>>, vector<32x128xf32>
    %cst = arith.constant dense<0.000000e+00> : vector<64x128xf32>
    %3 = tpu.matmul %1, %2, %cst {dimension_numbers = #tpu.dot_dimension_numbers<[1], [0], [0], [1], [0, 0, 1, 1], [], []>} : vector<64x32xf32>, vector<32x128xf32>, vector<64x128xf32> -> vector<64x128xf32>
    %c0_4 = arith.constant 0 : index
    %c0_5 = arith.constant 0 : index
    %4 = vector.load %arg4[%c0_4, %c0_5] : memref<1x128xf32, #tpu.memory_space<vmem>>, vector<1x128xf32>
    %5 = vector.broadcast %4 : vector<1x128xf32> to vector<64x128xf32>
    %6 = arith.addf %3, %5 : vector<64x128xf32>
    %7 = vector.shape_cast %6 : vector<64x128xf32> to vector<8x8x128xf32>
    %8 = tpu.iota {dimensions = array<i32: 1>} : vector<1x8x128xi32>
    %c7_i32 = arith.constant 7 : i32
    %9 = vector.broadcast %c7_i32 : i32 to vector<1x8x128xi32>
    %10 = arith.cmpi slt, %8, %9 : vector<1x8x128xi32>
    %11 = arith.extui %10 : vector<1x8x128xi1> to vector<1x8x128xi32>
    %12 = arith.sitofp %11 : vector<1x8x128xi32> to vector<1x8x128xf32>
    %13 = vector.broadcast %12 : vector<1x8x128xf32> to vector<8x8x128xf32>
    %14 = arith.mulf %7, %13 : vector<8x8x128xf32>
    %c0_6 = arith.constant 0 : index
    %c0_7 = arith.constant 0 : index
    %c0_8 = arith.constant 0 : index
    %15 = vector.load %arg9[%c0_6, %c0_7, %c0_8] : memref<8x8x128xf32, #tpu.memory_space<vmem>>, vector<8x8x128xf32>
    tpu.vector_store %arg9[%c0_6, %c0_7, %c0_8], %14 {strides = array<i32>} : memref<8x8x128xf32, #tpu.memory_space<vmem>>, vector<8x8x128xf32>,
    %cst_9 = arith.constant 0.000000e+00 : f32
    %16 = vector.broadcast %cst_9 : f32 to vector<8x32xf32>
    %c0_10 = arith.constant 0 : index
    %c0_11 = arith.constant 0 : index
    %17 = vector.load %arg10[%c0_10, %c0_11] : memref<8x32xf32, #tpu.memory_space<vmem>>, vector<8x32xf32>
    tpu.vector_store %arg10[%c0_10, %c0_11], %16 {strides = array<i32>} : memref<8x32xf32, #tpu.memory_space<vmem>>, vector<8x32xf32>,
    %18 = tpu.iota {dimensions = array<i32: 0>} : vector<8x128xi32>
    %c7_i32_12 = arith.constant 7 : i32
    %19 = vector.broadcast %c7_i32_12 : i32 to vector<8x128xi32>
    %20 = arith.cmpi slt, %18, %19 : vector<8x128xi32>
    %21 = arith.extui %20 : vector<8x128xi1> to vector<8x128xi32>
    %22 = arith.sitofp %21 : vector<8x128xi32> to vector<8x128xf32>
    %c0_13 = arith.constant 0 : index
    %c0_14 = arith.constant 0 : index
    %23 = vector.load %arg5[%c0_13, %c0_14] : memref<1x128xf32, #tpu.memory_space<vmem>>, vector<1x128xf32>
    %24 = vector.broadcast %23 : vector<1x128xf32> to vector<8x128xf32>
    %25 = arith.mulf %22, %24 : vector<8x128xf32>
    %cst_15 = arith.constant 0.000000e+00 : f32
    %26 = vector.broadcast %cst_15 : f32 to vector<8x32xf32>
    %c0_i32 = arith.constant 0 : i32
    %27 = arith.index_cast %c0_i32 : i32 to index
    %c0_16 = arith.constant 0 : index
    %c0_17 = arith.constant 0 : index
    %28 = vector.load %arg9[%27, %c0_16, %c0_17] : memref<8x8x128xf32, #tpu.memory_space<vmem>>, vector<1x8x128xf32>
    %29 = vector.shape_cast %28 : vector<1x8x128xf32> to vector<8x128xf32>
    %c0_18 = arith.constant 0 : index
    %c0_19 = arith.constant 0 : index
    %30 = vector.load %arg3[%c0_18, %c0_19] : memref<32x128xf32, #tpu.memory_space<vmem>>, vector<32x128xf32>
    %cst_20 = arith.constant dense<0.000000e+00> : vector<8x128xf32>
    %31 = tpu.matmul %26, %30, %cst_20 {dimension_numbers = #tpu.dot_dimension_numbers<[1], [0], [0], [1], [0, 0, 1, 1], [], []>} : vector<8x32xf32>, vector<32x128xf32>, vector<8x128xf32> -> vector<8x128xf32>
    %32 = arith.addf %31, %25 : vector<8x128xf32>
    %33 = arith.addf %29, %32 : vector<8x128xf32>
    %34 = arith.negf %33 : vector<8x128xf32>
    %35 = math.exp %34 : vector<8x128xf32>
    %cst_21 = arith.constant 1.000000e+00 : f32
    %36 = vector.broadcast %cst_21 : f32 to vector<8x128xf32>
    %37 = arith.addf %36, %35 : vector<8x128xf32>
    %38 = arith.divf %36, %37 : vector<8x128xf32>
    %c64_i32 = arith.constant 64 : i32
    %39 = tpu.dynamic_rotate %38 by %c64_i32 dim 1 : vector<8x128xf32>, i32 -> vector<8x128xf32>
    %40 = arith.mulf %39, %32 : vector<8x128xf32>
    %41 = arith.addf %29, %40 : vector<8x128xf32>
    %42 = math.tanh %41 : vector<8x128xf32>
    %43 = vector.extract_strided_slice %38 {offsets = [0, 32], sizes = [8, 32], strides = [1, 1]} : vector<8x128xf32> to vector<8x32xf32>
    %44 = vector.extract_strided_slice %42 {offsets = [0, 64], sizes = [8, 32], strides = [1, 1]} : vector<8x128xf32> to vector<8x32xf32>
    %cst_22 = arith.constant 1.000000e+00 : f32
    %45 = vector.broadcast %cst_22 : f32 to vector<8x32xf32>
    %46 = arith.subf %45, %43 : vector<8x32xf32>
    %47 = arith.mulf %46, %44 : vector<8x32xf32>
    %48 = arith.mulf %43, %26 : vector<8x32xf32>
    %49 = arith.addf %47, %48 : vector<8x32xf32>
    %cst_23 = arith.constant dense<0.000000e+00> : vector<32xf32>
    %50 = vector.multi_reduction <add>, %49, %cst_23 [0] : vector<8x32xf32> to vector<32xf32>
    %51 = vector.shape_cast %50 : vector<32xf32> to vector<1x32xf32>
    %52 = arith.index_cast %c0_i32 : i32 to index
    %c0_24 = arith.constant 0 : index
    %53 = vector.load %arg10[%52, %c0_24] : memref<8x32xf32, #tpu.memory_space<vmem>>, vector<1x32xf32>
    tpu.vector_store %arg10[%52, %c0_24], %51 {strides = array<i32>} : memref<8x32xf32, #tpu.memory_space<vmem>>, vector<1x32xf32>,
    %c1_i32 = arith.constant 1 : i32
    %54 = arith.index_cast %c1_i32 : i32 to index
    %c0_25 = arith.constant 0 : index
    %c0_26 = arith.constant 0 : index
    %55 = vector.load %arg9[%54, %c0_25, %c0_26] : memref<8x8x128xf32, #tpu.memory_space<vmem>>, vector<1x8x128xf32>
    %56 = vector.shape_cast %55 : vector<1x8x128xf32> to vector<8x128xf32>
    %c0_27 = arith.constant 0 : index
    %c0_28 = arith.constant 0 : index
    %57 = vector.load %arg3[%c0_27, %c0_28] : memref<32x128xf32, #tpu.memory_space<vmem>>, vector<32x128xf32>
    %cst_29 = arith.constant dense<0.000000e+00> : vector<8x128xf32>
    %58 = tpu.matmul %49, %57, %cst_29 {dimension_numbers = #tpu.dot_dimension_numbers<[1], [0], [0], [1], [0, 0, 1, 1], [], []>} : vector<8x32xf32>, vector<32x128xf32>, vector<8x128xf32> -> vector<8x128xf32>
    %59 = arith.addf %58, %25 : vector<8x128xf32>
    %60 = arith.addf %56, %59 : vector<8x128xf32>
    %61 = arith.negf %60 : vector<8x128xf32>
    %62 = math.exp %61 : vector<8x128xf32>
    %cst_30 = arith.constant 1.000000e+00 : f32
    %63 = vector.broadcast %cst_30 : f32 to vector<8x128xf32>
    %64 = arith.addf %63, %62 : vector<8x128xf32>
    %65 = arith.divf %63, %64 : vector<8x128xf32>
    %c64_i32_31 = arith.constant 64 : i32
    %66 = tpu.dynamic_rotate %65 by %c64_i32_31 dim 1 : vector<8x128xf32>, i32 -> vector<8x128xf32>
    %67 = arith.mulf %66, %59 : vector<8x128xf32>
    %68 = arith.addf %56, %67 : vector<8x128xf32>
    %69 = math.tanh %68 : vector<8x128xf32>
    %70 = vector.extract_strided_slice %65 {offsets = [0, 32], sizes = [8, 32], strides = [1, 1]} : vector<8x128xf32> to vector<8x32xf32>
    %71 = vector.extract_strided_slice %69 {offsets = [0, 64], sizes = [8, 32], strides = [1, 1]} : vector<8x128xf32> to vector<8x32xf32>
    %cst_32 = arith.constant 1.000000e+00 : f32
    %72 = vector.broadcast %cst_32 : f32 to vector<8x32xf32>
    %73 = arith.subf %72, %70 : vector<8x32xf32>
    %74 = arith.mulf %73, %71 : vector<8x32xf32>
    %75 = arith.mulf %70, %49 : vector<8x32xf32>
    %76 = arith.addf %74, %75 : vector<8x32xf32>
    %cst_33 = arith.constant dense<0.000000e+00> : vector<32xf32>
    %77 = vector.multi_reduction <add>, %76, %cst_33 [0] : vector<8x32xf32> to vector<32xf32>
    %78 = vector.shape_cast %77 : vector<32xf32> to vector<1x32xf32>
    %79 = arith.index_cast %c1_i32 : i32 to index
    %c0_34 = arith.constant 0 : index
    %80 = vector.load %arg10[%79, %c0_34] : memref<8x32xf32, #tpu.memory_space<vmem>>, vector<1x32xf32>
    tpu.vector_store %arg10[%79, %c0_34], %78 {strides = array<i32>} : memref<8x32xf32, #tpu.memory_space<vmem>>, vector<1x32xf32>,
    %c2_i32 = arith.constant 2 : i32
    %81 = arith.index_cast %c2_i32 : i32 to index
    %c0_35 = arith.constant 0 : index
    %c0_36 = arith.constant 0 : index
    %82 = vector.load %arg9[%81, %c0_35, %c0_36] : memref<8x8x128xf32, #tpu.memory_space<vmem>>, vector<1x8x128xf32>
    %83 = vector.shape_cast %82 : vector<1x8x128xf32> to vector<8x128xf32>
    %c0_37 = arith.constant 0 : index
    %c0_38 = arith.constant 0 : index
    %84 = vector.load %arg3[%c0_37, %c0_38] : memref<32x128xf32, #tpu.memory_space<vmem>>, vector<32x128xf32>
    %cst_39 = arith.constant dense<0.000000e+00> : vector<8x128xf32>
    %85 = tpu.matmul %76, %84, %cst_39 {dimension_numbers = #tpu.dot_dimension_numbers<[1], [0], [0], [1], [0, 0, 1, 1], [], []>} : vector<8x32xf32>, vector<32x128xf32>, vector<8x128xf32> -> vector<8x128xf32>
    %86 = arith.addf %85, %25 : vector<8x128xf32>
    %87 = arith.addf %83, %86 : vector<8x128xf32>
    %88 = arith.negf %87 : vector<8x128xf32>
    %89 = math.exp %88 : vector<8x128xf32>
    %cst_40 = arith.constant 1.000000e+00 : f32
    %90 = vector.broadcast %cst_40 : f32 to vector<8x128xf32>
    %91 = arith.addf %90, %89 : vector<8x128xf32>
    %92 = arith.divf %90, %91 : vector<8x128xf32>
    %c64_i32_41 = arith.constant 64 : i32
    %93 = tpu.dynamic_rotate %92 by %c64_i32_41 dim 1 : vector<8x128xf32>, i32 -> vector<8x128xf32>
    %94 = arith.mulf %93, %86 : vector<8x128xf32>
    %95 = arith.addf %83, %94 : vector<8x128xf32>
    %96 = math.tanh %95 : vector<8x128xf32>
    %97 = vector.extract_strided_slice %92 {offsets = [0, 32], sizes = [8, 32], strides = [1, 1]} : vector<8x128xf32> to vector<8x32xf32>
    %98 = vector.extract_strided_slice %96 {offsets = [0, 64], sizes = [8, 32], strides = [1, 1]} : vector<8x128xf32> to vector<8x32xf32>
    %cst_42 = arith.constant 1.000000e+00 : f32
    %99 = vector.broadcast %cst_42 : f32 to vector<8x32xf32>
    %100 = arith.subf %99, %97 : vector<8x32xf32>
    %101 = arith.mulf %100, %98 : vector<8x32xf32>
    %102 = arith.mulf %97, %76 : vector<8x32xf32>
    %103 = arith.addf %101, %102 : vector<8x32xf32>
    %cst_43 = arith.constant dense<0.000000e+00> : vector<32xf32>
    %104 = vector.multi_reduction <add>, %103, %cst_43 [0] : vector<8x32xf32> to vector<32xf32>
    %105 = vector.shape_cast %104 : vector<32xf32> to vector<1x32xf32>
    %106 = arith.index_cast %c2_i32 : i32 to index
    %c0_44 = arith.constant 0 : index
    %107 = vector.load %arg10[%106, %c0_44] : memref<8x32xf32, #tpu.memory_space<vmem>>, vector<1x32xf32>
    tpu.vector_store %arg10[%106, %c0_44], %105 {strides = array<i32>} : memref<8x32xf32, #tpu.memory_space<vmem>>, vector<1x32xf32>,
    %c3_i32 = arith.constant 3 : i32
    %108 = arith.index_cast %c3_i32 : i32 to index
    %c0_45 = arith.constant 0 : index
    %c0_46 = arith.constant 0 : index
    %109 = vector.load %arg9[%108, %c0_45, %c0_46] : memref<8x8x128xf32, #tpu.memory_space<vmem>>, vector<1x8x128xf32>
    %110 = vector.shape_cast %109 : vector<1x8x128xf32> to vector<8x128xf32>
    %c0_47 = arith.constant 0 : index
    %c0_48 = arith.constant 0 : index
    %111 = vector.load %arg3[%c0_47, %c0_48] : memref<32x128xf32, #tpu.memory_space<vmem>>, vector<32x128xf32>
    %cst_49 = arith.constant dense<0.000000e+00> : vector<8x128xf32>
    %112 = tpu.matmul %103, %111, %cst_49 {dimension_numbers = #tpu.dot_dimension_numbers<[1], [0], [0], [1], [0, 0, 1, 1], [], []>} : vector<8x32xf32>, vector<32x128xf32>, vector<8x128xf32> -> vector<8x128xf32>
    %113 = arith.addf %112, %25 : vector<8x128xf32>
    %114 = arith.addf %110, %113 : vector<8x128xf32>
    %115 = arith.negf %114 : vector<8x128xf32>
    %116 = math.exp %115 : vector<8x128xf32>
    %cst_50 = arith.constant 1.000000e+00 : f32
    %117 = vector.broadcast %cst_50 : f32 to vector<8x128xf32>
    %118 = arith.addf %117, %116 : vector<8x128xf32>
    %119 = arith.divf %117, %118 : vector<8x128xf32>
    %c64_i32_51 = arith.constant 64 : i32
    %120 = tpu.dynamic_rotate %119 by %c64_i32_51 dim 1 : vector<8x128xf32>, i32 -> vector<8x128xf32>
    %121 = arith.mulf %120, %113 : vector<8x128xf32>
    %122 = arith.addf %110, %121 : vector<8x128xf32>
    %123 = math.tanh %122 : vector<8x128xf32>
    %124 = vector.extract_strided_slice %119 {offsets = [0, 32], sizes = [8, 32], strides = [1, 1]} : vector<8x128xf32> to vector<8x32xf32>
    %125 = vector.extract_strided_slice %123 {offsets = [0, 64], sizes = [8, 32], strides = [1, 1]} : vector<8x128xf32> to vector<8x32xf32>
    %cst_52 = arith.constant 1.000000e+00 : f32
    %126 = vector.broadcast %cst_52 : f32 to vector<8x32xf32>
    %127 = arith.subf %126, %124 : vector<8x32xf32>
    %128 = arith.mulf %127, %125 : vector<8x32xf32>
    %129 = arith.mulf %124, %103 : vector<8x32xf32>
    %130 = arith.addf %128, %129 : vector<8x32xf32>
    %cst_53 = arith.constant dense<0.000000e+00> : vector<32xf32>
    %131 = vector.multi_reduction <add>, %130, %cst_53 [0] : vector<8x32xf32> to vector<32xf32>
    %132 = vector.shape_cast %131 : vector<32xf32> to vector<1x32xf32>
    %133 = arith.index_cast %c3_i32 : i32 to index
    %c0_54 = arith.constant 0 : index
    %134 = vector.load %arg10[%133, %c0_54] : memref<8x32xf32, #tpu.memory_space<vmem>>, vector<1x32xf32>
    tpu.vector_store %arg10[%133, %c0_54], %132 {strides = array<i32>} : memref<8x32xf32, #tpu.memory_space<vmem>>, vector<1x32xf32>,
    %c4_i32 = arith.constant 4 : i32
    %c0_55 = arith.constant 0 : index
    %c0_56 = arith.constant 0 : index
    %135 = vector.load %arg10[%c0_55, %c0_56] : memref<8x32xf32, #tpu.memory_space<vmem>>, vector<8x32xf32>
    %cst_57 = arith.constant 0.142857149 : f32
    %136 = vector.broadcast %cst_57 : f32 to vector<8x32xf32>
    %137 = arith.mulf %135, %136 : vector<8x32xf32>
    %c0_58 = arith.constant 0 : index
    %c0_59 = arith.constant 0 : index
    %138 = vector.load %arg6[%c0_58, %c0_59] : memref<1x32xf32, #tpu.memory_space<vmem>>, vector<1x32xf32>
    %139 = vector.broadcast %138 : vector<1x32xf32> to vector<8x32xf32>
    %140 = arith.mulf %137, %139 : vector<8x32xf32>
    %cst_60 = arith.constant dense<0.000000e+00> : vector<8xf32>
    %141 = vector.multi_reduction <add>, %140, %cst_60 [1] : vector<8x32xf32> to vector<8xf32>
    %142 = vector.shape_cast %141 : vector<8xf32> to vector<8x1xf32>
    %c0_61 = arith.constant 0 : index
    %c0_62 = arith.constant 0 : index
    %143 = memref.load %arg7[%c0_61, %c0_62] : memref<1x1xf32, #tpu.memory_space<smem>>
    %144 = vector.broadcast %143 : f32 to vector<8x1xf32>
    %145 = arith.addf %142, %144 : vector<8x1xf32>
    %146 = arith.negf %145 : vector<8x1xf32>
    %147 = math.exp %146 : vector<8x1xf32>
    %cst_63 = arith.constant 1.000000e+00 : f32
    %148 = vector.broadcast %cst_63 : f32 to vector<8x1xf32>
    %149 = arith.addf %148, %147 : vector<8x1xf32>
    %150 = arith.divf %148, %149 : vector<8x1xf32>
    %151 = vector.shape_cast %150 : vector<8x1xf32> to vector<8x1xf32>
    %152 = vector.broadcast %151 : vector<8x1xf32> to vector<8x128xf32>
    %c0_64 = arith.constant 0 : index
    %c0_65 = arith.constant 0 : index
    %153 = vector.load %arg8[%c0_64, %c0_65] : memref<8x128xf32, #tpu.memory_space<vmem>>, vector<8x128xf32>
    tpu.vector_store %arg8[%c0_64, %c0_65], %152 {strides = array<i32>} : memref<8x128xf32, #tpu.memory_space<vmem>>, vector<8x128xf32>,
    return
  }
  func.func @transform_0(%arg0: i32) -> (i32, i32, i32) {
    %c0_i32 = arith.constant 0 : i32
    %c0_i32_0 = arith.constant 0 : i32
    %c0_i32_1 = arith.constant 0 : i32
    %c0_i32_2 = arith.constant 0 : i32
    return %c0_i32, %c0_i32_0, %c0_i32_1 : i32, i32, i32
  }
  func.func @transform_1(%arg0: i32) -> (i32, i32) {
    %c0_i32 = arith.constant 0 : i32
    %c0_i32_0 = arith.constant 0 : i32
    %c0_i32_1 = arith.constant 0 : i32
    return %c0_i32, %c0_i32_0 : i32, i32
  }
  func.func @transform_2(%arg0: i32) -> (i32, i32) {
    %c0_i32 = arith.constant 0 : i32
    %c0_i32_0 = arith.constant 0 : i32
    %c0_i32_1 = arith.constant 0 : i32
    return %c0_i32, %c0_i32_0 : i32, i32
  }
  func.func @transform_3(%arg0: i32) -> (i32, i32) {
    %c0_i32 = arith.constant 0 : i32
    %c0_i32_0 = arith.constant 0 : i32
    %c0_i32_1 = arith.constant 0 : i32
    return %c0_i32, %c0_i32_0 : i32, i32
  }
  func.func @transform_4(%arg0: i32) -> (i32, i32) {
    %c0_i32 = arith.constant 0 : i32
    %c0_i32_0 = arith.constant 0 : i32
    %c0_i32_1 = arith.constant 0 : i32
    return %c0_i32, %c0_i32_0 : i32, i32
  }
  func.func @transform_5(%arg0: i32) -> (i32, i32) {
    %c0_i32 = arith.constant 0 : i32
    %c0_i32_0 = arith.constant 0 : i32
    %c0_i32_1 = arith.constant 0 : i32
    return %c0_i32, %c0_i32_0 : i32, i32
  }
  func.func @transform_6(%arg0: i32) -> (i32, i32) {
    %c0_i32 = arith.constant 0 : i32
    %c0_i32_0 = arith.constant 0 : i32
    %c0_i32_1 = arith.constant 0 : i32
    return %c0_i32, %c0_i32_0 : i32, i32
  }
  func.func @transform_7(%arg0: i32) -> (i32, i32) {
    %c0_i32 = arith.constant 0 : i32
    %c0_i32_0 = arith.constant 0 : i32
    %c0_i32_1 = arith.constant 0 : i32
    return %c0_i32, %c0_i32_0 : i32, i32
  }
}

</mosaic_0001>

<bundles_post_ra>
// kernel: tpu_custom_call.1
= control target key start
LH: loop header
LB: loop body
LE: loop exit
PB: predicated region body
PF: predicated region fallthrough
CT: control target
= control target key end

     0   :  { %13 = vsyncpa [#allocation6], 0  ;;  %s1236_s0 = inlined_call_operand.hbm [shape: f32[8,8,32], index: 0, kind: input, shape index: {}]   ;;  %s1237_s1 = inlined_call_operand.hbm [shape: f32[32,128], index: 1, kind: input, shape index: {}]   ;;  %s1238_s2 = inlined_call_operand.hbm [shape: f32[32,128], index: 2, kind: input, shape index: {}]   ;;  %s1239_s3 = inlined_call_operand.vmem [shape: f32[1,128], index: 3, kind: input, shape index: {}]   ;;  %s1240_s4 = inlined_call_operand.vmem [shape: f32[1,128], index: 4, kind: input, shape index: {}]   ;;  %s1241_s5 = inlined_call_operand.vmem [shape: f32[1,32], index: 5, kind: input, shape index: {}]   ;;  %s1242_s6 = inlined_call_operand.<no memory space> [shape: f32[1,1], index: 6, kind: input, shape index: {}]   ;;  %s1243_s7 = inlined_call_operand.hbm [shape: f32[8,128], index: 7, kind: output, shape index: {}]  }
   0x1   :  { %14 = vsyncpa [#allocation9], 0 }
   0x2   :  { %15 = vsyncpa [#allocation7], 0  ;;  %s1019_s24 = smov [#allocation8]   ;;  %s1020_s26 = smov [#allocation5]  }
   0x3   :  { %s33_s25 = sshll.u32 %s1019_s24, 4  ;;  %s21_s27 = sshll.u32 %s1020_s26, 4  ;;  %s34_s25 = int_to_ptr.vmem [resolvable:$true] %s33_s25  ;;  %s1070_s27 = int_to_ptr.vmem [resolvable:$true] %s21_s27 }
   0x4   :  { %s925_s30 = scalar_lea.hbm %s1237_s1, 512 }
   0x5   :  { %p926_p0 = scmp.ne.s32.totalorder %s1237_s1, %s925_s30  ;;  %p929_p1 = scmp.lt.u32.totalorder %s925_s30, %s1237_s1 }
   0x7   :  { %p931_p2 = pnand %p929_p1, %p926_p0 }
   0x9   :  { %934 = shalt.err (!%p931_p2)
}
   0xa   :  { %s935_s12 = scalar_lea.vmem %s34_s25, 512  ;;  %p940_p4 = scmp.lt.s32.totalorder %s34_s25, %s34_s25 }
   0xb   :  { %p936_p3 = scmp.ne.s32.totalorder %s34_s25, %s935_s12  ;;  %p941_p5 = scmp.lt.s32.totalorder %s935_s12, %s935_s12 }
   0xd   :  { %p942_p6 = por %p941_p5, %p940_p4 }
   0xf   :  { %p943_p7 = pnand %p942_p6, %p936_p3 }
  0x11   :  { %946 = shalt.err (!%p943_p7)
}
  0x12   :  { %s1021_s13 = smov 128   ;;  %s1022_s14 = smov 8  }
  0x13   :  { %39 = dma.hbm_to_vmem [thread:$0]  %s1237_s1, 512, %s34_s25, [#allocation9], %s1021_s13, %s1021_s13, %s1022_s14  }
  0x14   :  { %s947_s19 = scalar_lea.hbm %s1236_s0, 1024 }
  0x15   :  { %p948_p8 = scmp.ne.s32.totalorder %s1236_s0, %s947_s19  ;;  %p951_p9 = scmp.lt.u32.totalorder %s947_s19, %s1236_s0 }
  0x17   :  { %p953_p10 = pnand %p951_p9, %p948_p8 }
  0x19   :  { %956 = shalt.err (!%p953_p10)
}
  0x1a   :  { %s957_s24 = scalar_lea.vmem %s1070_s27, 1024  ;;  %p962_p12 = scmp.lt.s32.totalorder %s1070_s27, %s1070_s27 }
  0x1b   :  { %p958_p11 = scmp.ne.s32.totalorder %s1070_s27, %s957_s24  ;;  %p963_p13 = scmp.lt.s32.totalorder %s957_s24, %s957_s24 }
  0x1d   :  { %p964_p0 = por %p963_p13, %p962_p12 }
  0x1f   :  { %p965_p1 = pnand %p964_p0, %p958_p11 }
  0x21   :  { %968 = shalt.err (!%p965_p1)
}
  0x22   :  { %27 = dma.hbm_to_vmem [thread:$0]  %s1236_s0, 1024, %s1070_s27, [#allocation6], %s1021_s13, %s1021_s13, %s1022_s14  }
  0x23   :  { %s1023_s26 = smov [#allocation10]   ;;  %s969_s8 = scalar_lea.hbm %s1238_s2, 512 }
  0x24   :  { %s45_s28 = sshll.u32 %s1023_s26, 4  ;;  %p970_p2 = scmp.ne.s32.totalorder %s1238_s2, %s969_s8  ;;  %s46_s28 = int_to_ptr.vmem [resolvable:$true] %s45_s28 }
  0x25   :  { %p973_p3 = scmp.lt.u32.totalorder %s969_s8, %s1238_s2 }
  0x27   :  { %p975_p4 = pnand %p973_p3, %p970_p2 }
  0x29   :  { %978 = shalt.err (!%p975_p4)
}
  0x2a   :  { %s979_s15 = scalar_lea.vmem %s46_s28, 512  ;;  %p984_p6 = scmp.lt.s32.totalorder %s46_s28, %s46_s28 }
  0x2b   :  { %p980_p5 = scmp.ne.s32.totalorder %s46_s28, %s979_s15  ;;  %p985_p7 = scmp.lt.s32.totalorder %s979_s15, %s979_s15 }
  0x2d   :  { %p986_p8 = por %p985_p7, %p984_p6 }
  0x2f   :  { %p987_p9 = pnand %p986_p8, %p980_p5 }
  0x31   :  { %990 = shalt.err (!%p987_p9)
}
  0x32   :  { %51 = dma.hbm_to_vmem [thread:$0]  %s1238_s2, 512, %s46_s28, [#allocation9], %s1021_s13, %s1021_s13, %s1022_s14  }
  0x33   :  { %1013 = dma.done.wait [#allocation6], 1024  }
  0x34   :  { %1014 = vsyncadd [#allocation6], 4294966272 }
  0x35   :  { %1015 = dma.done.wait [#allocation9], 1024  }
  0x36   :  { %1016 = vsyncadd [#allocation9], 4294966272  ;;  %vm88_vm0 = vcmask 261120   ;;  %v1024_v0 = vmov 0.0|0.0   ;;  %vm1025_vm1 = vmmov 0   ;;  %v1026_v1 = vmov 0.0  }
  0x37   :  { %862 = vmatprep.subr.bf16.mxu1 %v1024_v0  ;;  %818 = vmatprep.mubr.msk.f32.mxu1 %vm1025_vm1, %v1026_v1  ;;  %239 = vst.msk [vmem:[#allocation3] sm:$0xff] %vm88_vm0, %v1026_v1  ;;  %v77_v2 = vld [vmem:[#allocation8] sm:$0xff]  ;;  %v78_v3 = vld [vmem:[#allocation8 + $0x8] sm:$0xff]  ;;  %v79_v7 = vld [vmem:[#allocation8 + $0x10] sm:$0xff]  ;;  %v218_v16 = vlaneseq  ;;  %vm346_vm3 = vcmask 523520   ;;  %vm358_vm4 = vcmask 253952  }
  0x38   :  { %v249_v4 = vld [vmem:[#allocation10] sm:$0xff]  ;;  %v854_v5 = vpack.c.bf16 %v78_v3, %v77_v2  ;;  %v250_v6 = vld [vmem:[#allocation10 + $0x8] sm:$0xff]  ;;  %v80_v8 = vld [vmem:[#allocation8 + $0x18] sm:$0xff]  ;;  %s1029_s21 = smov [#allocation11]  }
  0x39   :  { %v1127_v9 = vpack.c.bf16 %v250_v6, %v249_v4  ;;  %v858_v10 = vpack.c.bf16 %v80_v8, %v79_v7  ;;  %v69_v11 = vld [vmem:[#allocation5] sm:$0xff]  ;;  %v251_v12 = vld [vmem:[#allocation10 + $0x10] sm:$0xff]  ;;  %v252_v13 = vld [vmem:[#allocation10 + $0x18] sm:$0xff]  ;;  %v219_v17 = vshrl.u32 %v218_v16, 7  ;;  %s728_s22 = sshll.u32 %s1029_s21, 4  ;;  %s729_s22 = int_to_ptr.vmem [resolvable:$true] %s728_s22 }
  0x3a   :  { %855 = vmatprep.subr.bf16.mxu0 %v854_v5  ;;  %798 = vmatprep.mubr.msk.f32.mxu0 %vm88_vm0, %v69_v11  ;;  %v866_v14 = vpack.c.bf16 %v252_v13, %v251_v12  ;;  %v70_v15 = vld [vmem:[#allocation5 + $0x8] sm:$0xff]  ;;  %v748_v19 = vld [vmem:[%s1240_s4] ss:$0 sm:$0xff]  ;;  %s1027_s4 = smov 64   ;;  %v71_v57 = vld [vmem:[#allocation5 + $0x10] sm:$0xff]  ;;  %p996_p11 = scmp.lt.s32.totalorder %s729_s22, %s729_s22 }
  0x3b   :  { %857 = vmatpush3.bf16.msra.mxu0 %v854_v5  ;;  %864 = vmatpush3.bf16.msra.mxu1 %v1127_v9  ;;  %vm220_vm2 = vcmp.lt.s32.totalorder %v219_v17, 7  ;;  %v1155_v21 = vld [vmem:[%s1239_s3] ss:$0 sm:$0xff]  ;;  %s1028_s3 = smov 96   ;;  %v73_v59 = vld [vmem:[#allocation5 + $0x20] sm:$0xff]  ;;  %v74_v60 = vld [vmem:[#allocation5 + $0x28] sm:$0xff] }
  0x3c   :  { %859 = vmatprep.subr.bf16.mxu0 %v858_v10  ;;  %865 = vmatprep.subr.bf16.mxu1 %v1024_v0  ;;  %v1144_v18 = vsel %vm220_vm2, 1.0, %v1026_v1  ;;  %v72_v58 = vld [vmem:[#allocation5 + $0x18] sm:$0xff]  ;;  %v75_v61 = vld [vmem:[#allocation5 + $0x30] sm:$0xff] }
  0x3d   :  { %v1150_v20 = vmul.f32 %v748_v19, %v1144_v18  ;;  %v76_v63 = vld [vmem:[#allocation5 + $0x38] sm:$0xff] }
  0x3f   :  { %861 = vmatpush3.bf16.msra.mxu0 %v858_v10  ;;  %867 = vmatpush3.bf16.msra.mxu1 %v866_v14 }
  0x40   :  { %868 = vmatprep.subr.bf16.mxu1 %v1024_v0  ;;  %874 = vmatprep.subr.bf16.mxu0 %v1024_v0 }
  0x42   :  { %799 = vmatmul.mubr.msk.f32.vlgmr.msra.gmra.mrb[0].mxu0 %vm88_vm0, %v70_v15  ;;  %819 = vmatmul.mubr.f32.vlgmr.msra.gmra.mrb[0].mxu1 %v1026_v1 }
  0x43   :  { %870 = vmatpush3.bf16.msra.mxu1 %v1127_v9  ;;  %829 = vmatprep.mubr.msk.f32.mxu1 %vm1025_vm1, %v1026_v1 }
  0x44   :  { %871 = vmatprep.subr.bf16.mxu1 %v1024_v0  ;;  %876 = vmatpush3.bf16.msra.mxu0 %v1127_v9 }
  0x45   :  { %877 = vmatprep.subr.bf16.mxu0 %v1024_v0  ;;  %801 = vmatprep.mubr.msk.f32.mxu0 %vm88_vm0, %v71_v57 }
  0x46   :  { %802 = vmatmul.mubr.msk.f32.gmra.mrb[2].mxu0 %vm88_vm0, %v72_v58 }
  0x47   :  { %873 = vmatpush3.bf16.msra.mxu1 %v866_v14  ;;  %804 = vmatprep.mubr.msk.f32.mxu0 %vm88_vm0, %v73_v59 }
  0x48   :  { %879 = vmatpush3.bf16.msra.mxu0 %v866_v14  ;;  %880 = vmatprep.subr.bf16.mxu1 %v1024_v0 }
  0x4a   :  { %805 = vmatmul.mubr.msk.f32.gmra.mrb[4].mxu0 %vm88_vm0, %v74_v60 }
  0x4b   :  { %807 = vmatprep.mubr.msk.f32.mxu0 %vm88_vm0, %v75_v61 }
  0x4e   :  { %808 = vmatmul.mubr.msk.f32.gmra.mrb[6].mxu0 %vm88_vm0, %v76_v63 }
  0x4f   :  { %840 = vmatprep.mubr.msk.f32.mxu0 %vm1025_vm1, %v1026_v1 }
 0x115   :  { %v800_v22 = vpop.f32.mrb[0].mxu0  ;;  %v322_v23 = vpop.f32.mrb[0].mxu1 }
 0x116   :  { %v179_v24 = vpop.f32.mrb[1].mxu0  ;;  %v820_v25 = vpop.f32.mrb[1].mxu1  ;;  %v323_v27 = vadd.f32 %v322_v23, %v1150_v20  ;;  %v185_v44 = vadd.f32 %v800_v22, %v1155_v21 }
 0x117   :  { %v180_v26 = vadd.f32 %v1155_v21, %v179_v24 }
 0x118   :  { %v224_v46 = vmul.f32 %v1144_v18, %v185_v44 }
 0x119   :  { %v223_v28 = vmul.f32 %v1144_v18, %v180_v26  ;;  %v803_v6 = vpop.f32.mrb[2].mxu0 }
 0x11a   :  { %v189_v7 = vpop.f32.mrb[3].mxu0 }
 0x11b   :  { %v326_v29 = vadd.f32 %v323_v27, %v223_v28 }
 0x11d   :  { %v749_v30 = vmul.f32 -1.442695, %v326_v29  ;;  %v806_v8 = vpop.f32.mrb[4].mxu0 }
 0x11f   :  { %897 = vpow2.f32 %v749_v30 }
 0x129   :  { %v898_v31 = vpop.eup %897 }
 0x12a   :  { %v330_v32 = vadd.f32 1.0, %v898_v31 }
 0x12c   :  { %899 = vrcp.f32 %v330_v32 }
 0x136   :  { %v900_v33 = vpop.eup %899 }
 0x137   :  { %333 = vrot.lane.b32.xlu0 %v900_v33, %s1027_s4  ;;  %v338_v38 = vsub.f32 1.0, %v900_v33  ;;  %v344_v41 = vmul.f32 0.0, %v900_v33 }
 0x1a9   :  { %v334_v34 = vpop.permute.xlu0 %333 }
 0x1aa   :  { %v335_v35 = vmul.f32 %v334_v34, %v323_v27 }
 0x1ac   :  { %v336_v36 = vadd.f32 %v335_v35, %v223_v28  ;;  %v195_v35 = vadd.f32 %v803_v6, %v1155_v21 }
 0x1ae   :  { %901 = vtanh.f32 %v336_v36 }
 0x1b8   :  { %v902_v37 = vpop.eup %901 }
 0x1b9   :  { %340 = vrot.lane.b32.xlu0 %v902_v37, %s1028_s3  ;;  %v226_v37 = vmul.f32 %v1144_v18, %v195_v35 }
 0x22b   :  { %v341_v39 = vpop.permute.xlu0 %340 }
 0x22c   :  { %v343_v40 = vmul.f32 %v341_v39, %v338_v38 }
 0x22e   :  { %v1162_v42 = vadd.f32 %v344_v41, %v343_v40 }
 0x230   :  { %367 = vrot.lane.b32.xlu1 %v1162_v42, %s1028_s3 }
 0x2a2   :  { %v368_v43 = vpop.permute.xlu1 %367 }
 0x2a3   :  { %830 = vmatmul.mubr.msk.f32.vlgmr.msra.gmra.mrb[2].mxu1 %vm88_vm0, %v368_v43  ;;  %v347_v43 = vsel %vm346_vm3, %v1162_v42, 0.0 }
 0x2a4   :  { %882 = vmatpush3.bf16.msra.mxu1 %v1127_v9  ;;  %851 = vmatprep.mubr.msk.f32.mxu1 %vm1025_vm1, %v1026_v1  ;;  %v199_v9 = vpop.f32.mrb[5].mxu0  ;;  %v190_v1 = vadd.f32 %v1155_v21, %v189_v7  ;;  %v348_v44 = vrot.slane %v347_v43, 4 }
 0x2a5   :  { %883 = vmatprep.subr.bf16.mxu1 %v1024_v0  ;;  %v809_v10 = vpop.f32.mrb[6].mxu0 }
 0x2a6   :  { %v209_v11 = vpop.f32.mrb[7].mxu0 }
 0x2a8   :  { %885 = vmatpush3.bf16.msra.mxu1 %v866_v14  ;;  %v225_v14 = vmul.f32 %v1144_v18, %v190_v1 }
 0x376   :  { %v437_v45 = vpop.f32.mrb[2].mxu1 }
 0x377   :  { %v438_v47 = vadd.f32 %v437_v45, %v1150_v20  ;;  %v831_v48 = vpop.f32.mrb[3].mxu1 }
 0x378   :  { %v349_v48 = vadd.f32 %v348_v44, %v347_v43 }
 0x379   :  { %v441_v49 = vadd.f32 %v438_v47, %v224_v46 }
 0x37b   :  { %v751_v50 = vmul.f32 -1.442695, %v441_v49  ;;  %v350_v49 = vrot.slane %v349_v48, 2 }
 0x37d   :  { %903 = vpow2.f32 %v751_v50  ;;  %v351_v50 = vadd.f32 %v350_v49, %v349_v48 }
 0x387   :  { %v904_v51 = vpop.eup %903 }
 0x388   :  { %v445_v52 = vadd.f32 1.0, %v904_v51  ;;  %v352_v51 = vrot.slane %v351_v50, 1 }
 0x38a   :  { %905 = vrcp.f32 %v445_v52 }
 0x394   :  { %v906_v53 = vpop.eup %905 }
 0x395   :  { %448 = vrot.lane.b32.xlu1 %v906_v53, %s1027_s4  ;;  %v453_v0 = vsub.f32 1.0, %v906_v53  ;;  %v459_v4 = vmul.f32 %v906_v53, %v1162_v42 }
 0x407   :  { %v449_v54 = vpop.permute.xlu1 %448 }
 0x408   :  { %v450_v55 = vmul.f32 %v449_v54, %v438_v47  ;;  %v353_v54 = vadd.f32 %v352_v51, %v351_v50 }
 0x40a   :  { %v451_v56 = vadd.f32 %v450_v55, %v224_v46 }
 0x40c   :  { %907 = vtanh.f32 %v451_v56 }
 0x416   :  { %v908_v62 = vpop.eup %907 }
 0x417   :  { %455 = vrot.lane.b32.xlu0 %v908_v62, %s1028_s3 }
 0x489   :  { %v456_v2 = vpop.permute.xlu0 %455 }
 0x48a   :  { %v458_v3 = vmul.f32 %v456_v2, %v453_v0 }
 0x48c   :  { %v1185_v5 = vadd.f32 %v459_v4, %v458_v3 }
 0x48e   :  { %480 = vrot.lane.b32.xlu1 %v1185_v5, %s1028_s3  ;;  %v461_v56 = vsel %vm346_vm3, %v1185_v5, 0.0 }
 0x48f   :  { %v462_v57 = vrot.slane %v461_v56, 4 }
 0x491   :  { %v463_v60 = vadd.f32 %v462_v57, %v461_v56 }
 0x493   :  { %v464_v63 = vrot.slane %v463_v60, 2 }
 0x495   :  { %v465_v2 = vadd.f32 %v464_v63, %v463_v60 }
 0x497   :  { %v466_v3 = vrot.slane %v465_v2, 1 }
 0x500   :  { %v481_v12 = vpop.permute.xlu1 %480 }
 0x501   :  { %841 = vmatmul.mubr.msk.f32.vlgmr.msra.gmra.mrb[8].mxu0 %vm88_vm0, %v481_v12 }
 0x5d4   :  { %v550_v13 = vpop.f32.mrb[8].mxu0 }
 0x5d5   :  { %v551_v15 = vadd.f32 %v550_v13, %v1150_v20  ;;  %v842_v16 = vpop.f32.mrb[9].mxu0 }
 0x5d7   :  { %v554_v17 = vadd.f32 %v551_v15, %v225_v14 }
 0x5d9   :  { %v753_v19 = vmul.f32 -1.442695, %v554_v17 }
 0x5db   :  { %909 = vpow2.f32 %v753_v19 }
 0x5e5   :  { %v910_v22 = vpop.eup %909 }
 0x5e6   :  { %v558_v23 = vadd.f32 1.0, %v910_v22 }
 0x5e8   :  { %911 = vrcp.f32 %v558_v23  ;;  %v756_v23 = vld [vmem:[%s1241_s5] ss:$0 sm:$0xff]  ;;  %s991_s5 = scalar_lea.vmem %s729_s22, 128 }
 0x5e9   :  { %p992_p10 = scmp.ne.s32.totalorder %s729_s22, %s991_s5  ;;  %p997_p12 = scmp.lt.s32.totalorder %s991_s5, %s991_s5 }
 0x5eb   :  { %p998_p13 = por %p997_p12, %p996_p11 }
 0x5ed   :  { %p999_p0 = pnand %p998_p13, %p992_p10 }
 0x5f2   :  { %v912_v24 = vpop.eup %911 }
 0x5f3   :  { %561 = vrot.lane.b32.xlu0 %v912_v24, %s1027_s4  ;;  %v566_v29 = vsub.f32 1.0, %v912_v24  ;;  %v572_v32 = vmul.f32 %v912_v24, %v1185_v5  ;;  %v467_v5 = vadd.f32 %v466_v3, %v465_v2 }
 0x665   :  { %v562_v25 = vpop.permute.xlu0 %561 }
 0x666   :  { %v563_v26 = vmul.f32 %v562_v25, %v551_v15 }
 0x668   :  { %v564_v27 = vadd.f32 %v563_v26, %v225_v14 }
 0x66a   :  { %913 = vtanh.f32 %v564_v27  ;;  %v713_v27 = vstv %s1242_s6 }
 0x674   :  { %v914_v28 = vpop.eup %913 }
 0x675   :  { %568 = vrot.lane.b32.xlu1 %v914_v28, %s1028_s3 }
 0x6e7   :  { %v569_v30 = vpop.permute.xlu1 %568 }
 0x6e8   :  { %v571_v31 = vmul.f32 %v569_v30, %v566_v29 }
 0x6ea   :  { %v573_v33 = vadd.f32 %v572_v32, %v571_v31 }
 0x6ec   :  { %593 = vrot.lane.b32.xlu0 %v573_v33, %s1028_s3  ;;  %v574_v45 = vsel %vm346_vm3, %v573_v33, 0.0 }
 0x6ed   :  { %v575_v47 = vrot.slane %v574_v45, 4 }
 0x6ef   :  { %v576_v18 = vadd.f32 %v575_v47, %v574_v45 }
 0x75e   :  { %v594_v34 = vpop.permute.xlu0 %593 }
 0x75f   :  { %852 = vmatmul.mubr.msk.f32.vlgmr.msra.gmra.mrb[4].mxu1 %vm88_vm0, %v594_v34 }
 0x832   :  { %v663_v36 = vpop.f32.mrb[4].mxu1 }
 0x833   :  { %v664_v38 = vadd.f32 %v663_v36, %v1150_v20  ;;  %v853_v39 = vpop.f32.mrb[5].mxu1  ;;  %v577_v20 = vrot.slane %v576_v18, 2 }
 0x835   :  { %v667_v40 = vadd.f32 %v664_v38, %v226_v37  ;;  %v578_v52 = vadd.f32 %v577_v20, %v576_v18 }
 0x837   :  { %v755_v41 = vmul.f32 -1.442695, %v667_v40  ;;  %v579_v55 = vrot.slane %v578_v52, 1 }
 0x839   :  { %915 = vpow2.f32 %v755_v41  ;;  %v580_v42 = vadd.f32 %v579_v55, %v578_v52 }
 0x843   :  { %v916_v46 = vpop.eup %915 }
 0x844   :  { %v671_v21 = vadd.f32 1.0, %v916_v46 }
 0x846   :  { %917 = vrcp.f32 %v671_v21 }
 0x850   :  { %v918_v53 = vpop.eup %917 }
 0x851   :  { %674 = vrot.lane.b32.xlu1 %v918_v53, %s1027_s4  ;;  %v679_v6 = vsub.f32 1.0, %v918_v53  ;;  %v685_v9 = vmul.f32 %v918_v53, %v573_v33 }
 0x855   :  { %355 = vrot.lane.b32.xlu1 %v353_v54, %s1028_s3 }
 0x859   :  { %582 = vrot.lane.b32.xlu1 %v580_v42, %s1028_s3 }
 0x8c3   :  { %v675_v58 = vpop.permute.xlu1 %674 }
 0x8c4   :  { %v676_v59 = vmul.f32 %v675_v58, %v664_v38 }
 0x8c6   :  { %v677_v61 = vadd.f32 %v676_v59, %v226_v37 }
 0x8c7   :  { %v356_v62 = vpop.permute.xlu1 %355 }
 0x8c8   :  { %919 = vtanh.f32 %v677_v61  ;;  %359 = vst.msk [vmem:[#allocation3] sm:$0x1] %vm358_vm4, %v356_v62 }
 0x8cb   :  { %v583_v0 = vpop.permute.xlu1 %582 }
 0x8cc   :  { %585 = vst.msk [vmem:[#allocation3 + $0x2] sm:$0x1] %vm358_vm4, %v583_v0 }
 0x8d2   :  { %v920_v4 = vpop.eup %919 }
 0x8d3   :  { %681 = vrot.lane.b32.xlu0 %v920_v4, %s1028_s3 }
 0x8d7   :  { %469 = vrot.lane.b32.xlu0 %v467_v5, %s1028_s3 }
 0x945   :  { %v682_v7 = vpop.permute.xlu0 %681 }
 0x946   :  { %v684_v8 = vmul.f32 %v682_v7, %v679_v6 }
 0x948   :  { %v686_v10 = vadd.f32 %v685_v9, %v684_v8 }
 0x949   :  { %v470_v11 = vpop.permute.xlu0 %469 }
 0x94a   :  { %v687_v12 = vsel %vm346_vm3, %v686_v10, 0.0  ;;  %472 = vst.msk [vmem:[#allocation3 + $0x1] sm:$0x1] %vm358_vm4, %v470_v11 }
 0x94b   :  { %v688_v1 = vrot.slane %v687_v12, 4 }
 0x94d   :  { %v689_v13 = vadd.f32 %v688_v1, %v687_v12 }
 0x94f   :  { %v690_v14 = vrot.slane %v689_v13, 2 }
 0x951   :  { %v691_v15 = vadd.f32 %v690_v14, %v689_v13 }
 0x953   :  { %v692_v16 = vrot.slane %v691_v15, 1 }
 0x955   :  { %v693_v17 = vadd.f32 %v692_v16, %v691_v15 }
 0x957   :  { %695 = vrot.lane.b32.xlu0 %v693_v17, %s1028_s3 }
 0x9c9   :  { %v696_v19 = vpop.permute.xlu0 %695 }
 0x9ca   :  { %698 = vst.msk [vmem:[#allocation3 + $0x3] sm:$0x1] %vm358_vm4, %v696_v19 }
 0x9d1   :  { %v699_v22 = vld [vmem:[#allocation3] sm:$0xff] }
 0x9d2   :  { %v700_v24 = vmul.f32 0.14285715, %v699_v22 }
 0x9d4   :  { %v708_v25 = vmul.f32 %v756_v23, %v700_v24 }
 0x9d6   :  { %v709_v26 = vsel %vm88_vm0, %v708_v25, 0.0 }
 0x9d7   :  { %710 = vadd.xlane.f32.xlu1 %v709_v26 }
 0xa64   :  { %v711_v28 = vpop.xlane.xlu1 %710 }
 0xa65   :  { %v714_v29 = vadd.f32 %v713_v27, %v711_v28 }
 0xa67   :  { %v757_v30 = vmul.f32 -1.442695, %v714_v29 }
 0xa69   :  { %921 = vpow2.f32 %v757_v30 }
 0xa73   :  { %v922_v31 = vpop.eup %921 }
 0xa74   :  { %v718_v32 = vadd.f32 1.0, %v922_v31 }
 0xa76   :  { %923 = vrcp.f32 %v718_v32 }
 0xa80   :  { %v924_v33 = vpop.eup %923 }
 0xa81   :  { %721 = vst [vmem:[#allocation11] sm:$0xff] %v924_v33 }
 0xa82   :  { %1002 = shalt.err (!%p999_p0)
}
 0xa83   :  { %s1003_s24 = scalar_lea.hbm %s1243_s7, 128 }
 0xa84   :  { %p1004_p1 = scmp.ne.s32.totalorder %s1243_s7, %s1003_s24  ;;  %p1007_p2 = scmp.lt.u32.totalorder %s1003_s24, %s1243_s7 }
 0xa86   :  { %p1009_p3 = pnand %p1007_p2, %p1004_p1 }
 0xa88   :  { %1012 = shalt.err (!%p1009_p3)
}
 0xa89   :  { %731 = dma.vmem_to_hbm [thread:$0]  %s729_s22, 128, %s1243_s7, [#allocation7]  }
 0xa8a   :  { %1017 = dma.done.wait [#allocation7], 128  }
 0xa8b   :  { %1018 = vsyncadd [#allocation7], 4294967168 }
 0xa8c   :  { %735 = vsyncpa [#allocation6], 1 }
 0xa8d   :  { %736 = vsyncpa [#allocation9], 1 }
 0xa8e   :  { %737 = vsyncpa [#allocation7], 1 }

</bundles_post_ra>
